<compile_context>
chip_gen: v5e
topology: v5e:2x2
jax: 0.10.0
libtpu: 0.0.40
codegen_flags: <defaults>
</compile_context>

<pallas_src>
import jax
import jax.numpy as jnp
from jax.experimental import pallas as pl
from jax.experimental.pallas import tpu as pltpu

K = 5  # base_conv kernel_size (padding='same', stride=1)


def eeg_kernel(x_ref, we_ref, be_ref, wcf_ref, bc_ref, sc_ref,
               w1_ref, b1_ref, w2_ref, b2_ref, w3_ref, b3_ref,
               out_ref):
    # x_ref block: (Bb, T, C) — Bb batch elements per grid step
    Bb, T, C = x_ref.shape
    E = we_ref.shape[1]
    pad = (K - 1) // 2

    # embed: Linear(C -> E) on the flattened (Bb*T, C) matrix (one big MXU matmul)
    x2 = x_ref[...].reshape(Bb * T, C)
    h2 = jnp.dot(x2, we_ref[...],
                 preferred_element_type=jnp.float32) + be_ref[...]      # (Bb*T, E)
    h3 = h2.reshape(Bb, T, E)

    # base_conv (Conv1d, 'same' padding) as ONE fused matmul:
    #   zero-pad h along T once, stack the K shifted views on the lane axis and
    #   contract against w_conv reshaped to (K*E, E).
    zpad = jnp.zeros((Bb, pad, E), jnp.float32)
    h_pad = jnp.concatenate([zpad, h3, zpad], axis=1)                   # (Bb, T+2p, E)
    hs3 = jnp.concatenate([h_pad[:, k:k + T, :] for k in range(K)],
                          axis=-1)                                      # (Bb, T, K*E)
    hs2 = hs3.reshape(Bb * T, K * E)
    conv2 = jnp.dot(hs2, wcf_ref[...],
                    preferred_element_type=jnp.float32) + bc_ref[...]   # (Bb*T, E)

    # base_scale (per-channel scale) + residual with x_tag (== embedded x)
    y2 = sc_ref[...] * conv2 + h2                                       # (Bb*T, E)

    # temporal mean pooling (mean over T)
    pooled = jnp.mean(y2.reshape(Bb, T, E), axis=1)                     # (Bb, E)

    # classifier: Linear -> ReLU -> Linear -> ReLU -> Linear (batched, M=Bb)
    z = jnp.maximum(jnp.dot(pooled, w1_ref[...],
                            preferred_element_type=jnp.float32) + b1_ref[...], 0.0)
    z = jnp.maximum(jnp.dot(z, w2_ref[...],
                            preferred_element_type=jnp.float32) + b2_ref[...], 0.0)
    logits = jnp.dot(z, w3_ref[...],
                     preferred_element_type=jnp.float32) + b3_ref[...]  # (Bb, NCp)

    out_ref[...] = logits                                               # lane-dense store


def _pick_block_batch(B, T, C, E):
    """Largest per-step batch that keeps the block working set small enough for
    the scoped-VMEM defaults on all of v5e / v6e / v7x."""
    # dominant f32 live bytes per example: x tile, h, h_pad, stacked (K*E) copy,
    # conv output, residual (double-buffered x accounted with the 2x factor).
    per_ex = 4 * (2 * T * C + 3 * T * E + T * K * E + (T + K) * E)
    budget = 8 * 1024 * 1024                 # ~8 MiB working set per block
    bb = max(1, budget // max(per_ex, 1))
    if bb >= B:
        return B                             # single block covers the whole batch
    return max(8, (bb // 8) * 8)             # multi-block: keep output rows 8-aligned


def eeg_emotion_forward(x, params):
    """x: (B, 1, C, T) float32.  Returns logits (B, num_classes)."""
    B, _, C, T = x.shape
    E = params["w_embed"].shape[1]
    NC = params["w3"].shape[1]
    NCp = ((NC + 127) // 128) * 128          # lane-dense logits slab

    Bb = _pick_block_batch(B, T, C, E)
    Bp = ((B + Bb - 1) // Bb) * Bb

    x_btc = jnp.transpose(x[:, 0], (0, 2, 1))                           # (B, T, C)
    if Bp != B:
        x_btc = jnp.pad(x_btc, ((0, Bp - B), (0, 0), (0, 0)))

    w_conv_fused = params["w_conv"].reshape(K * E, E)                   # (K*E, E)
    w3p = jnp.pad(params["w3"], ((0, 0), (0, NCp - NC)))
    b3p = jnp.pad(params["b3"], ((0, 0), (0, NCp - NC)))

    def full(shape):
        return pl.BlockSpec(shape, lambda b: (0,) * len(shape))

    out = pl.pallas_call(
        eeg_kernel,
        out_shape=jax.ShapeDtypeStruct((Bp, NCp), jnp.float32),
        grid=(Bp // Bb,),
        in_specs=[
            pl.BlockSpec((Bb, T, C), lambda b: (b, 0, 0)),              # x per block
            full((C, E)), full((1, E)),                                 # embed W, b
            full((K * E, E)), full((1, E)),                             # fused conv W, b
            full((1, E)),                                               # base_scale
            full((E, E // 2)), full((1, E // 2)),                       # classifier 1
            full((E // 2, E // 4)), full((1, E // 4)),                  # classifier 2
            full((E // 4, NCp)), full((1, NCp)),                        # classifier 3 (padded)
        ],
        out_specs=pl.BlockSpec((Bb, NCp), lambda b: (b, 0)),
        compiler_params=pltpu.CompilerParams(
            dimension_semantics=("parallel",)),
    )(x_btc,
      params["w_embed"], params["b_embed"],
      w_conv_fused, params["b_conv"],
      params["scale"],
      params["w1"], params["b1"],
      params["w2"], params["b2"],
      w3p, b3p)
    return out[:B, :NC]


def reference_forward(x, params):
    """Pure-JAX reference (independent code path) for correctness checking."""
    h = jnp.einsum("bct,ce->bte", x[:, 0], params["w_embed"]) + params["b_embed"]
    pad = (K - 1) // 2
    T = h.shape[1]
    hp = jnp.pad(h, ((0, 0), (pad, pad), (0, 0)))
    conv = params["b_conv"][None] + sum(
        jnp.einsum("bte,eo->bto", hp[:, k:k + T], params["w_conv"][k])
        for k in range(K))
    y = params["scale"][None] * conv + h
    pooled = y.mean(axis=1)
    z = jax.nn.relu(pooled @ params["w1"] + params["b1"])
    z = jax.nn.relu(z @ params["w2"] + params["b2"])
    return z @ params["w3"] + params["b3"]


if __name__ == "__main__":
    B, C, T, E, NC = 2, 4, 16, 32, 3   # batch, in_channels, time, embed_size, classes

    key = jax.random.PRNGKey(0)
    keys = jax.random.split(key, 12)
    x = jax.random.normal(keys[0], (B, 1, C, T), jnp.float32)

    # Deterministic synthetic parameters.  Linear / Conv1d weights are stored
    # pre-transposed for the (T, C) @ (C, E) kernel layout:
    #   torch Linear weight (out,in)   -> here (in, out)
    #   torch Conv1d weight (out,in,K) -> here (K, in, out)
    params = dict(
        w_embed=0.3 * jax.random.normal(keys[1], (C, E), jnp.float32),
        b_embed=0.1 * jax.random.normal(keys[2], (1, E), jnp.float32),
        w_conv=0.2 * jax.random.normal(keys[3], (K, E, E), jnp.float32),
        b_conv=0.1 * jax.random.normal(keys[4], (1, E), jnp.float32),
        scale=jnp.ones((1, E), jnp.float32),                 # _ScaleModule init
        w1=0.3 * jax.random.normal(keys[5], (E, E // 2), jnp.float32),
        b1=0.1 * jax.random.normal(keys[6], (1, E // 2), jnp.float32),
        w2=0.3 * jax.random.normal(keys[7], (E // 2, E // 4), jnp.float32),
        b2=0.1 * jax.random.normal(keys[8], (1, E // 4), jnp.float32),
        w3=0.3 * jax.random.normal(keys[9], (E // 4, NC), jnp.float32),
        b3=0.1 * jax.random.normal(keys[10], (1, NC), jnp.float32),
    )

    logits = jax.block_until_ready(eeg_emotion_forward(x, params))
    ref = reference_forward(x, params)

    assert logits.shape == (B, NC), logits.shape
    assert jnp.allclose(logits, ref, atol=1e-4, rtol=1e-4), (
        "mismatch", logits, ref)
    print("KERNEL_OK")
</pallas_src>

<mosaic_0001>
module attributes {stable_mosaic.version = 11 : i64} {
  func.func @eeg_kernel(%arg0: i32, %arg1: memref<2x16x4xf32, #tpu.memory_space<vmem>>, %arg2: memref<4x32xf32, #tpu.memory_space<vmem>>, %arg3: memref<1x32xf32, #tpu.memory_space<vmem>>, %arg4: memref<160x32xf32, #tpu.memory_space<vmem>>, %arg5: memref<1x32xf32, #tpu.memory_space<vmem>>, %arg6: memref<1x32xf32, #tpu.memory_space<vmem>>, %arg7: memref<32x16xf32, #tpu.memory_space<vmem>>, %arg8: memref<1x16xf32, #tpu.memory_space<vmem>>, %arg9: memref<16x8xf32, #tpu.memory_space<vmem>>, %arg10: memref<1x8xf32, #tpu.memory_space<vmem>>, %arg11: memref<8x128xf32, #tpu.memory_space<vmem>>, %arg12: memref<1x128xf32, #tpu.memory_space<vmem>>, %arg13: memref<2x128xf32, #tpu.memory_space<vmem>>) attributes {dimension_semantics = [#tpu.dimension_semantics<parallel>], iteration_bounds = array<i64: 1>, scalar_prefetch = 0 : i64, scratch_operands = 0 : i64, tpu.core_type = #tpu.core_type<tc>, window_params = [{transform_indices = @transform_0, window_bounds = array<i64: 2, 16, 4>}, {pipeline_mode = #tpu.pipeline_mode<synchronous>, transform_indices = @transform_1, window_bounds = array<i64: 4, 32>}, {pipeline_mode = #tpu.pipeline_mode<synchronous>, transform_indices = @transform_2, window_bounds = array<i64: 1, 32>}, {pipeline_mode = #tpu.pipeline_mode<synchronous>, transform_indices = @transform_3, window_bounds = array<i64: 160, 32>}, {pipeline_mode = #tpu.pipeline_mode<synchronous>, transform_indices = @transform_4, window_bounds = array<i64: 1, 32>}, {pipeline_mode = #tpu.pipeline_mode<synchronous>, transform_indices = @transform_5, window_bounds = array<i64: 1, 32>}, {pipeline_mode = #tpu.pipeline_mode<synchronous>, transform_indices = @transform_6, window_bounds = array<i64: 32, 16>}, {pipeline_mode = #tpu.pipeline_mode<synchronous>, transform_indices = @transform_7, window_bounds = array<i64: 1, 16>}, {pipeline_mode = #tpu.pipeline_mode<synchronous>, transform_indices = @transform_8, window_bounds = array<i64: 16, 8>}, {pipeline_mode = #tpu.pipeline_mode<synchronous>, transform_indices = @transform_9, window_bounds = array<i64: 1, 8>}, {pipeline_mode = #tpu.pipeline_mode<synchronous>, transform_indices = @transform_10, window_bounds = array<i64: 8, 128>}, {pipeline_mode = #tpu.pipeline_mode<synchronous>, transform_indices = @transform_11, window_bounds = array<i64: 1, 128>}, {transform_indices = @transform_12, window_bounds = array<i64: 2, 128>}]} {
    %c0 = arith.constant 0 : index
    %c0_0 = arith.constant 0 : index
    %c0_1 = arith.constant 0 : index
    %0 = vector.load %arg1[%c0, %c0_0, %c0_1] : memref<2x16x4xf32, #tpu.memory_space<vmem>>, vector<2x16x4xf32>
    %1 = vector.shape_cast %0 : vector<2x16x4xf32> to vector<32x4xf32>
    %c0_2 = arith.constant 0 : index
    %c0_3 = arith.constant 0 : index
    %2 = vector.load %arg2[%c0_2, %c0_3] : memref<4x32xf32, #tpu.memory_space<vmem>>, vector<4x32xf32>
    %cst = arith.constant dense<0.000000e+00> : vector<32x32xf32>
    %3 = tpu.matmul %1, %2, %cst {dimension_numbers = #tpu.dot_dimension_numbers<[1], [0], [0], [1], [0, 0, 1, 1], [], []>} : vector<32x4xf32>, vector<4x32xf32>, vector<32x32xf32> -> vector<32x32xf32>
    %c0_4 = arith.constant 0 : index
    %c0_5 = arith.constant 0 : index
    %4 = vector.load %arg3[%c0_4, %c0_5] : memref<1x32xf32, #tpu.memory_space<vmem>>, vector<1x32xf32>
    %5 = vector.broadcast %4 : vector<1x32xf32> to vector<32x32xf32>
    %6 = arith.addf %3, %5 : vector<32x32xf32>
    %7 = vector.shape_cast %6 : vector<32x32xf32> to vector<2x16x32xf32>
    %cst_6 = arith.constant 0.000000e+00 : f32
    %8 = vector.broadcast %cst_6 : f32 to vector<2x2x32xf32>
    %9 = tpu.concatenate %8, %7, %8 in 1 : vector<2x2x32xf32>, vector<2x16x32xf32>, vector<2x2x32xf32> -> vector<2x20x32xf32>
    %10 = vector.extract_strided_slice %9 {offsets = [0, 0, 0], sizes = [2, 16, 32], strides = [1, 1, 1]} : vector<2x20x32xf32> to vector<2x16x32xf32>
    %11 = vector.extract_strided_slice %9 {offsets = [0, 1, 0], sizes = [2, 16, 32], strides = [1, 1, 1]} : vector<2x20x32xf32> to vector<2x16x32xf32>
    %12 = vector.extract_strided_slice %9 {offsets = [0, 2, 0], sizes = [2, 16, 32], strides = [1, 1, 1]} : vector<2x20x32xf32> to vector<2x16x32xf32>
    %13 = vector.extract_strided_slice %9 {offsets = [0, 3, 0], sizes = [2, 16, 32], strides = [1, 1, 1]} : vector<2x20x32xf32> to vector<2x16x32xf32>
    %14 = vector.extract_strided_slice %9 {offsets = [0, 4, 0], sizes = [2, 16, 32], strides = [1, 1, 1]} : vector<2x20x32xf32> to vector<2x16x32xf32>
    %15 = tpu.concatenate %10, %11, %12, %13, %14 in 2 : vector<2x16x32xf32>, vector<2x16x32xf32>, vector<2x16x32xf32>, vector<2x16x32xf32>, vector<2x16x32xf32> -> vector<2x16x160xf32>
    %16 = vector.shape_cast %15 : vector<2x16x160xf32> to vector<32x160xf32>
    %c0_7 = arith.constant 0 : index
    %c0_8 = arith.constant 0 : index
    %17 = vector.load %arg4[%c0_7, %c0_8] : memref<160x32xf32, #tpu.memory_space<vmem>>, vector<160x32xf32>
    %cst_9 = arith.constant dense<0.000000e+00> : vector<32x32xf32>
    %18 = tpu.matmul %16, %17, %cst_9 {dimension_numbers = #tpu.dot_dimension_numbers<[1], [0], [0], [1], [0, 0, 1, 1], [], []>} : vector<32x160xf32>, vector<160x32xf32>, vector<32x32xf32> -> vector<32x32xf32>
    %c0_10 = arith.constant 0 : index
    %c0_11 = arith.constant 0 : index
    %19 = vector.load %arg5[%c0_10, %c0_11] : memref<1x32xf32, #tpu.memory_space<vmem>>, vector<1x32xf32>
    %20 = vector.broadcast %19 : vector<1x32xf32> to vector<32x32xf32>
    %21 = arith.addf %18, %20 : vector<32x32xf32>
    %c0_12 = arith.constant 0 : index
    %c0_13 = arith.constant 0 : index
    %22 = vector.load %arg6[%c0_12, %c0_13] : memref<1x32xf32, #tpu.memory_space<vmem>>, vector<1x32xf32>
    %23 = vector.broadcast %22 : vector<1x32xf32> to vector<32x32xf32>
    %24 = arith.mulf %23, %21 : vector<32x32xf32>
    %25 = arith.addf %24, %6 : vector<32x32xf32>
    %26 = vector.shape_cast %25 : vector<32x32xf32> to vector<2x16x32xf32>
    %cst_14 = arith.constant dense<0.000000e+00> : vector<2x32xf32>
    %27 = vector.multi_reduction <add>, %26, %cst_14 [1] : vector<2x16x32xf32> to vector<2x32xf32>
    %cst_15 = arith.constant 1.600000e+01 : f32
    %28 = vector.broadcast %cst_15 : f32 to vector<2x32xf32>
    %29 = arith.divf %27, %28 : vector<2x32xf32>
    %c0_16 = arith.constant 0 : index
    %c0_17 = arith.constant 0 : index
    %30 = vector.load %arg7[%c0_16, %c0_17] : memref<32x16xf32, #tpu.memory_space<vmem>>, vector<32x16xf32>
    %cst_18 = arith.constant dense<0.000000e+00> : vector<2x16xf32>
    %31 = tpu.matmul %29, %30, %cst_18 {dimension_numbers = #tpu.dot_dimension_numbers<[1], [0], [0], [1], [0, 0, 1, 1], [], []>} : vector<2x32xf32>, vector<32x16xf32>, vector<2x16xf32> -> vector<2x16xf32>
    %c0_19 = arith.constant 0 : index
    %c0_20 = arith.constant 0 : index
    %32 = vector.load %arg8[%c0_19, %c0_20] : memref<1x16xf32, #tpu.memory_space<vmem>>, vector<1x16xf32>
    %33 = vector.broadcast %32 : vector<1x16xf32> to vector<2x16xf32>
    %34 = arith.addf %31, %33 : vector<2x16xf32>
    %cst_21 = arith.constant 0.000000e+00 : f32
    %35 = vector.broadcast %cst_21 : f32 to vector<2x16xf32>
    %36 = arith.maximumf %34, %35 : vector<2x16xf32>
    %c0_22 = arith.constant 0 : index
    %c0_23 = arith.constant 0 : index
    %37 = vector.load %arg9[%c0_22, %c0_23] : memref<16x8xf32, #tpu.memory_space<vmem>>, vector<16x8xf32>
    %cst_24 = arith.constant dense<0.000000e+00> : vector<2x8xf32>
    %38 = tpu.matmul %36, %37, %cst_24 {dimension_numbers = #tpu.dot_dimension_numbers<[1], [0], [0], [1], [0, 0, 1, 1], [], []>} : vector<2x16xf32>, vector<16x8xf32>, vector<2x8xf32> -> vector<2x8xf32>
    %c0_25 = arith.constant 0 : index
    %c0_26 = arith.constant 0 : index
    %39 = vector.load %arg10[%c0_25, %c0_26] : memref<1x8xf32, #tpu.memory_space<vmem>>, vector<1x8xf32>
    %40 = vector.broadcast %39 : vector<1x8xf32> to vector<2x8xf32>
    %41 = arith.addf %38, %40 : vector<2x8xf32>
    %cst_27 = arith.constant 0.000000e+00 : f32
    %42 = vector.broadcast %cst_27 : f32 to vector<2x8xf32>
    %43 = arith.maximumf %41, %42 : vector<2x8xf32>
    %c0_28 = arith.constant 0 : index
    %c0_29 = arith.constant 0 : index
    %44 = vector.load %arg11[%c0_28, %c0_29] : memref<8x128xf32, #tpu.memory_space<vmem>>, vector<8x128xf32>
    %cst_30 = arith.constant dense<0.000000e+00> : vector<2x128xf32>
    %45 = tpu.matmul %43, %44, %cst_30 {dimension_numbers = #tpu.dot_dimension_numbers<[1], [0], [0], [1], [0, 0, 1, 1], [], []>} : vector<2x8xf32>, vector<8x128xf32>, vector<2x128xf32> -> vector<2x128xf32>
    %c0_31 = arith.constant 0 : index
    %c0_32 = arith.constant 0 : index
    %46 = vector.load %arg12[%c0_31, %c0_32] : memref<1x128xf32, #tpu.memory_space<vmem>>, vector<1x128xf32>
    %47 = vector.broadcast %46 : vector<1x128xf32> to vector<2x128xf32>
    %48 = arith.addf %45, %47 : vector<2x128xf32>
    %c0_33 = arith.constant 0 : index
    %c0_34 = arith.constant 0 : index
    %49 = vector.load %arg13[%c0_33, %c0_34] : memref<2x128xf32, #tpu.memory_space<vmem>>, vector<2x128xf32>
    tpu.vector_store %arg13[%c0_33, %c0_34], %48 {strides = array<i32>} : memref<2x128xf32, #tpu.memory_space<vmem>>, vector<2x128xf32>,
    return
  }
  func.func @transform_0(%arg0: i32) -> (i32, i32, i32) {
    %c0_i32 = arith.constant 0 : i32
    %c0_i32_0 = arith.constant 0 : i32
    %c0_i32_1 = arith.constant 0 : i32
    return %arg0, %c0_i32, %c0_i32_0 : i32, i32, i32
  }
  func.func @transform_1(%arg0: i32) -> (i32, i32) {
    %c0_i32 = arith.constant 0 : i32
    %c0_i32_0 = arith.constant 0 : i32
    %c0_i32_1 = arith.constant 0 : i32
    return %c0_i32, %c0_i32_0 : i32, i32
  }
  func.func @transform_2(%arg0: i32) -> (i32, i32) {
    %c0_i32 = arith.constant 0 : i32
    %c0_i32_0 = arith.constant 0 : i32
    %c0_i32_1 = arith.constant 0 : i32
    return %c0_i32, %c0_i32_0 : i32, i32
  }
  func.func @transform_3(%arg0: i32) -> (i32, i32) {
    %c0_i32 = arith.constant 0 : i32
    %c0_i32_0 = arith.constant 0 : i32
    %c0_i32_1 = arith.constant 0 : i32
    return %c0_i32, %c0_i32_0 : i32, i32
  }
  func.func @transform_4(%arg0: i32) -> (i32, i32) {
    %c0_i32 = arith.constant 0 : i32
    %c0_i32_0 = arith.constant 0 : i32
    %c0_i32_1 = arith.constant 0 : i32
    return %c0_i32, %c0_i32_0 : i32, i32
  }
  func.func @transform_5(%arg0: i32) -> (i32, i32) {
    %c0_i32 = arith.constant 0 : i32
    %c0_i32_0 = arith.constant 0 : i32
    %c0_i32_1 = arith.constant 0 : i32
    return %c0_i32, %c0_i32_0 : i32, i32
  }
  func.func @transform_6(%arg0: i32) -> (i32, i32) {
    %c0_i32 = arith.constant 0 : i32
    %c0_i32_0 = arith.constant 0 : i32
    %c0_i32_1 = arith.constant 0 : i32
    return %c0_i32, %c0_i32_0 : i32, i32
  }
  func.func @transform_7(%arg0: i32) -> (i32, i32) {
    %c0_i32 = arith.constant 0 : i32
    %c0_i32_0 = arith.constant 0 : i32
    %c0_i32_1 = arith.constant 0 : i32
    return %c0_i32, %c0_i32_0 : i32, i32
  }
  func.func @transform_8(%arg0: i32) -> (i32, i32) {
    %c0_i32 = arith.constant 0 : i32
    %c0_i32_0 = arith.constant 0 : i32
    %c0_i32_1 = arith.constant 0 : i32
    return %c0_i32, %c0_i32_0 : i32, i32
  }
  func.func @transform_9(%arg0: i32) -> (i32, i32) {
    %c0_i32 = arith.constant 0 : i32
    %c0_i32_0 = arith.constant 0 : i32
    %c0_i32_1 = arith.constant 0 : i32
    return %c0_i32, %c0_i32_0 : i32, i32
  }
  func.func @transform_10(%arg0: i32) -> (i32, i32) {
    %c0_i32 = arith.constant 0 : i32
    %c0_i32_0 = arith.constant 0 : i32
    %c0_i32_1 = arith.constant 0 : i32
    return %c0_i32, %c0_i32_0 : i32, i32
  }
  func.func @transform_11(%arg0: i32) -> (i32, i32) {
    %c0_i32 = arith.constant 0 : i32
    %c0_i32_0 = arith.constant 0 : i32
    %c0_i32_1 = arith.constant 0 : i32
    return %c0_i32, %c0_i32_0 : i32, i32
  }
  func.func @transform_12(%arg0: i32) -> (i32, i32) {
    %c0_i32 = arith.constant 0 : i32
    %c0_i32_0 = arith.constant 0 : i32
    return %arg0, %c0_i32 : i32, i32
  }
}

</mosaic_0001>

<bundles_post_ra>
// kernel: tpu_custom_call.1
= control target key start
LH: loop header
LB: loop body
LE: loop exit
PB: predicated region body
PF: predicated region fallthrough
CT: control target
= control target key end

     0   :  { %vm64_vm0 = vcmask 1043456   ;;  %vm51_vm1 = vcmask 31744   ;;  %s799_s0 = inlined_call_operand.vmem [shape: f32[2,16,4], index: 0, kind: input, shape index: {}]   ;;  %s800_s1 = inlined_call_operand.vmem [shape: f32[4,32], index: 1, kind: input, shape index: {}]   ;;  %s801_s2 = inlined_call_operand.vmem [shape: f32[1,32], index: 2, kind: input, shape index: {}]   ;;  %s802_s3 = inlined_call_operand.vmem [shape: f32[160,32], index: 3, kind: input, shape index: {}]   ;;  %s803_s4 = inlined_call_operand.vmem [shape: f32[1,32], index: 4, kind: input, shape index: {}]   ;;  %s804_s5 = inlined_call_operand.vmem [shape: f32[1,32], index: 5, kind: input, shape index: {}]   ;;  %s805_s6 = inlined_call_operand.vmem [shape: f32[32,16], index: 6, kind: input, shape index: {}]   ;;  %s806_s7 = inlined_call_operand.vmem [shape: f32[1,16], index: 7, kind: input, shape index: {}]   ;;  %s807_s8 = inlined_call_operand.vmem [shape: f32[16,8], index: 8, kind: input, shape index: {}]   ;;  %s808_s9 = inlined_call_operand.vmem [shape: f32[1,8], index: 9, kind: input, shape index: {}]   ;;  %s809_s10 = inlined_call_operand.vmem [shape: f32[8,128], index: 10, kind: input, shape index: {}]   ;;  %s810_s11 = inlined_call_operand.vmem [shape: f32[1,128], index: 11, kind: input, shape index: {}]   ;;  %s811_s12 = inlined_call_operand.hbm [shape: f32[2,128], index: 12, kind: output, shape index: {}]  }
   0x1   :  { %v46_v0 = vld [vmem:[%s800_s1] sm:$0xf] }
   0x2   :  { %v42_v1 = vld [vmem:[%s799_s0] sm:$0xff]  ;;  %457 = vmatpush.msk.msra.mxu0 %vm64_vm0, %v46_v0 }
   0x3   :  { %458 = vmatmul.msk.f32.vlgmr.msra.gmra.mxu0 %vm51_vm1, %v42_v1 }
   0x4   :  { %17 = vsyncpa [#allocation3], 0  ;;  %v43_v2 = vld [vmem:[%s799_s0 + $0x8] sm:$0xff]  ;;  %v44_v3 = vld [vmem:[%s799_s0 + $0x10] sm:$0xff]  ;;  %vm101_vm2 = vcmask 1041408   ;;  %vm201_vm3 = vcmask 261120  }
   0x5   :  { %v45_v4 = vld [vmem:[%s799_s0 + $0x18] sm:$0xff]  ;;  %v234_v6 = vld [vmem:[%s802_s3 + $0x90] sm:$0xff]  ;;  %v233_v7 = vld [vmem:[%s802_s3 + $0x88] sm:$0xff]  ;;  %vm168_vm4 = vcmask 1044480   ;;  %vm122_vm5 = vcmask 1046528   ;;  %s514_s21 = smov 32  }
   0x6   :  { %v235_v5 = vld [vmem:[%s802_s3 + $0x98] sm:$0xff]  ;;  %v232_v8 = vld [vmem:[%s802_s3 + $0x80] sm:$0xff]  ;;  %vm145_vm6 = vcmask 1045504   ;;  %s515_s22 = smov 64   ;;  %vm206_vm7 = vcmask 523264   ;;  %vm211_vm8 = vcmask 785408  }
   0x7   :  { %289 = vmatpush.msra.mxu2 %v235_v5  ;;  %v479_v9 = vld [vmem:[%s801_s2] ss:$0 sm:$0xff]  ;;  %s513_s2 = smov 96   ;;  %v231_v5 = vld [vmem:[%s802_s3 + $0x78] sm:$0xff]  ;;  %vm355_vm10 = vcmask 1041409   ;;  %vm386_vm11 = vcmask 130048  }
   0x8   :  { %248 = vmatpush.msra.mxu1 %v231_v5  ;;  %vm416_vm12 = vcmask 64512   ;;  %s517_s30 = smov [#allocation2]  }
   0x9   :  { %290 = vmatpush.msra.mxu2 %v234_v6  ;;  %v230_v6 = vld [vmem:[%s802_s3 + $0x70] sm:$0xff] }
   0xa   :  { %249 = vmatpush.msra.mxu1 %v230_v6 }
   0xb   :  { %459 = vmatmul.msk.f32.gmra.mxu0 %vm51_vm1, %v43_v2  ;;  %291 = vmatpush.msra.mxu2 %v233_v7  ;;  %v229_v7 = vld [vmem:[%s802_s3 + $0x68] sm:$0xff] }
   0xc   :  { %250 = vmatpush.msra.mxu1 %v229_v7 }
   0xd   :  { %292 = vmatpush.msra.mxu2 %v232_v8  ;;  %v228_v8 = vld [vmem:[%s802_s3 + $0x60] sm:$0xff] }
   0xe   :  { %251 = vmatpush.msra.mxu1 %v228_v8 }
  0x13   :  { %460 = vmatmul.msk.f32.gmra.mxu0 %vm51_vm1, %v44_v3 }
  0x1b   :  { %461 = vmatmul.msk.f32.gmra.mxu0 %vm51_vm1, %v45_v4 }
  0x80   :  { %v85_v10 = vpop.f32.mrf.mxu0 }
  0x81   :  { %v614_v11 = vadd.f32 %v479_v9, %v85_v10  ;;  %v226_v10 = vld [vmem:[%s802_s3 + $0x50] sm:$0xff] }
  0x83   :  { %v102_v12 = vrot.slane %v614_v11, 6 }
  0x85   :  { %v618_v14 = vsel %vm101_vm2, 0.0, %v102_v12 }
  0x86   :  { %v191_v17 = vrot.slane %v618_v14, 4  ;;  %v169_v20 = vrot.slane %v618_v14, 3  ;;  %v123_v21 = vrot.slane %v618_v14, 1  ;;  %v146_v44 = vrot.slane %v618_v14, 2 }
  0x88   :  { %v88_v13 = vpop.f32.mrf.mxu0 }
  0x89   :  { %v620_v15 = vadd.f32 %v479_v9, %v88_v13  ;;  %v224_v13 = vld [vmem:[%s802_s3 + $0x40] sm:$0xff] }
  0x8b   :  { %v103_v16 = vrot.slane %v620_v15, 6 }
  0x8d   :  { %v625_v18 = vsel %vm101_vm2, %v102_v12, %v103_v16  ;;  %v116_v19 = vsel %vm101_vm2, %v103_v16, 0.0  ;;  %v225_v12 = vld [vmem:[%s802_s3 + $0x48] sm:$0xff]  ;;  %v223_v16 = vld [vmem:[%s802_s3 + $0x38] sm:$0xff] }
  0x8e   :  { %v192_v22 = vrot.slane %v625_v18, 4  ;;  %v170_v23 = vrot.slane %v625_v18, 3  ;;  %v172_v24 = vrot.slane %v116_v19, 3  ;;  %v124_v25 = vrot.slane %v625_v18, 1 }
  0x8f   :  { %v126_v26 = vrot.slane %v116_v19, 1  ;;  %v194_v35 = vrot.slane %v116_v19, 4  ;;  %v147_v37 = vrot.slane %v625_v18, 2  ;;  %v149_v38 = vrot.slane %v116_v19, 2  ;;  %v221_v19 = vld [vmem:[%s802_s3 + $0x28] sm:$0xff] }
  0x90   :  { %v91_v27 = vpop.f32.mrf.mxu0  ;;  %v193_v28 = vsel %vm64_vm0, %v191_v17, %v192_v22  ;;  %v173_v29 = vsel %vm168_vm4, %v170_v23, %v172_v24  ;;  %v171_v30 = vsel %vm168_vm4, %v169_v20, %v170_v23  ;;  %v125_v31 = vsel %vm122_vm5, %v123_v21, %v124_v25  ;;  %v222_v17 = vld [vmem:[%s802_s3 + $0x30] sm:$0xff]  ;;  %v220_v20 = vld [vmem:[%s802_s3 + $0x20] sm:$0xff]  ;;  %v219_v21 = vld [vmem:[%s802_s3 + $0x18] sm:$0xff] }
  0x91   :  { %v637_v32 = vadd.f32 %v479_v9, %v91_v27  ;;  %462 = vmatmul.msk.f32.vlgmr.msra.gmra.mxu2 %vm201_vm3, %v193_v28  ;;  %181 = vrot.lane.b32.xlu2 %v173_v29, %s513_s2  ;;  %v127_v33 = vsel %vm122_vm5, %v124_v25, %v126_v26  ;;  %v195_v40 = vsel %vm64_vm0, %v192_v22, %v194_v35  ;;  %v218_v22 = vld [vmem:[%s802_s3 + $0x10] sm:$0xff]  ;;  %v217_v23 = vld [vmem:[%s802_s3 + $0x8] sm:$0xff]  ;;  %v216_v24 = vld [vmem:[%s802_s3] sm:$0xff] }
  0x92   :  { %179 = vrot.lane.b32.xlu1 %v171_v30, %s513_s2  ;;  %v474_v34 = vpack.i.bf16 %v127_v33, %v125_v31  ;;  %v150_v43 = vsel %vm145_vm6, %v147_v37, %v149_v38  ;;  %v148_v46 = vsel %vm145_vm6, %v146_v44, %v147_v37 }
  0x93   :  { %v105_v36 = vrot.slane %v637_v32, 6 }
  0x94   :  { %475 = vrot.lane.b32.xlu0 %v474_v34, %s514_s21 }
  0x95   :  { %v648_v41 = vsel %vm101_vm2, 0.0, %v105_v36 }
  0x96   :  { %v196_v47 = vrot.slane %v648_v41, 4  ;;  %v128_v48 = vrot.slane %v648_v41, 1  ;;  %v174_v49 = vrot.slane %v648_v41, 3  ;;  %v151_v51 = vrot.slane %v648_v41, 2 }
  0x98   :  { %v94_v39 = vpop.f32.mrf.mxu0 }
  0x99   :  { %v650_v42 = vadd.f32 %v479_v9, %v94_v39  ;;  %463 = vmatmul.msk.f32.gmra.mxu2 %vm201_vm3, %v195_v40  ;;  %v227_v9 = vld [vmem:[%s802_s3 + $0x58] sm:$0xff]  ;;  %s448_s3 = sshll.u32 %s811_s12, 4  ;;  %s449_s3 = int_to_ptr.hbm [resolvable:$true] %s448_s3 }
  0x9a   :  { %158 = vrot.lane.b32.xlu1 %v150_v43, %s515_s22  ;;  %252 = vmatpush.msra.mxu1 %v227_v9  ;;  %v381_v9 = vld [vmem:[%s807_s8 + $0x8] sm:$0xff] }
  0x9b   :  { %v106_v45 = vrot.slane %v650_v42, 6 }
  0x9c   :  { %156 = vrot.lane.b32.xlu0 %v148_v46, %s515_s22  ;;  %253 = vmatpush.msra.mxu1 %v226_v10 }
  0x9d   :  { %v663_v50 = vsel %vm101_vm2, %v105_v36, %v106_v45  ;;  %v117_v59 = vsel %vm101_vm2, %v106_v45, 0.0 }
  0x9e   :  { %v197_v52 = vrot.slane %v663_v50, 4  ;;  %v129_v53 = vrot.slane %v663_v50, 1  ;;  %v175_v54 = vrot.slane %v663_v50, 3  ;;  %v152_v55 = vrot.slane %v663_v50, 2  ;;  %254 = vmatpush.msra.mxu1 %v225_v12 }
  0x9f   :  { %v199_v61 = vrot.slane %v117_v59, 4  ;;  %v131_v62 = vrot.slane %v117_v59, 1  ;;  %v177_v63 = vrot.slane %v117_v59, 3  ;;  %v154_v0 = vrot.slane %v117_v59, 2 }
  0xa0   :  { %v198_v56 = vsel %vm64_vm0, %v196_v47, %v197_v52  ;;  %v130_v57 = vsel %vm122_vm5, %v128_v48, %v129_v53  ;;  %v176_v58 = vsel %vm168_vm4, %v174_v49, %v175_v54  ;;  %v153_v60 = vsel %vm145_vm6, %v151_v51, %v152_v55  ;;  %255 = vmatpush.msra.mxu1 %v224_v13 }
  0xa1   :  { %464 = vmatmul.msk.f32.gmra.mxu2 %vm201_vm3, %v198_v56  ;;  %137 = vrot.lane.b32.xlu2 %v130_v57, %s514_s21  ;;  %v200_v1 = vsel %vm64_vm0, %v197_v52, %v199_v61  ;;  %v132_v2 = vsel %vm122_vm5, %v129_v53, %v131_v62  ;;  %v178_v3 = vsel %vm168_vm4, %v175_v54, %v177_v63  ;;  %v348_v56 = vld [vmem:[%s805_s6 + $0x18] sm:$0xff]  ;;  %v345_v62 = vld [vmem:[%s805_s6] sm:$0xff]  ;;  %v516_v12 = vmov 16.0  }
  0xa2   :  { %183 = vrot.lane.b32.xlu1 %v176_v58, %s513_s2  ;;  %v155_v4 = vsel %vm145_vm6, %v152_v55, %v154_v0  ;;  %256 = vmatpush.msra.mxu1 %v223_v16  ;;  %v481_v58 = vld [vmem:[%s804_s5] ss:$0 sm:$0xff]  ;;  %485 = vrcp.f32 %v516_v12 }
  0xa3   :  { %371 = vmatpush.msra.mxu3 %v348_v56  ;;  %v484_v56 = vld [vmem:[%s810_s11] ss:$0 sm:$0xff] }
  0xa4   :  { %160 = vrot.lane.b32.xlu0 %v153_v60, %s515_s22  ;;  %257 = vmatpush.msra.mxu1 %v222_v17  ;;  %v346_v60 = vld [vmem:[%s805_s6 + $0x8] sm:$0xff] }
  0xa6   :  { %258 = vmatpush.msra.mxu1 %v221_v19 }
  0xa8   :  { %259 = vmatpush.msra.mxu1 %v220_v20  ;;  %v486_v19 = vpop.eup %485 }
  0xa9   :  { %465 = vmatmul.msk.f32.gmra.mxu2 %vm201_vm3, %v200_v1  ;;  %139 = vrot.lane.b32.xlu2 %v132_v2, %s514_s21  ;;  %vm341_vm9 = vweird.f32 %v486_v19 }
  0xaa   :  { %185 = vrot.lane.b32.xlu1 %v178_v3, %s513_s2  ;;  %260 = vmatpush.msra.mxu1 %v219_v21 }
  0xac   :  { %162 = vrot.lane.b32.xlu0 %v155_v4, %s515_s22  ;;  %261 = vmatpush.msra.mxu1 %v218_v22 }
  0xae   :  { %262 = vmatpush.msra.mxu1 %v217_v23 }
  0xb0   :  { %263 = vmatpush.msra.mxu1 %v216_v24 }
  0xeb   :  { %v182_v30 = vpop.permute.xlu2 %181 }
  0xfb   :  { %v138_v38 = vpop.permute.xlu2 %137 }
 0x103   :  { %v140_v46 = vpop.permute.xlu2 %139 }
 0x104   :  { %v180_v26 = vpop.permute.xlu1 %179 }
 0x106   :  { %v476_v25 = vpop.permute.xlu0 %475 }
 0x107   :  { %v477_v27 = vunpack.i.l.bf16 %v476_v25  ;;  %v478_v33 = vunpack.i.h.bf16 %v476_v25  ;;  %v337_v25 = vmul.f32 16.0, %v486_v19 }
 0x109   :  { %v202_v29 = vsel %vm201_vm3, %v618_v14, %v477_v27  ;;  %v203_v36 = vsel %vm201_vm3, %v625_v18, %v478_v33  ;;  %v204_v14 = vsel %vm201_vm3, %v648_v41, %v138_v38  ;;  %v205_v18 = vsel %vm201_vm3, %v663_v50, %v140_v46  ;;  %v480_v41 = vld [vmem:[%s803_s4] ss:$0 sm:$0xff]  ;;  %v347_v50 = vld [vmem:[%s805_s6 + $0x10] sm:$0xff] }
 0x10a   :  { %372 = vmatpush.msra.mxu3 %v347_v50 }
 0x10c   :  { %v159_v35 = vpop.permute.xlu1 %158  ;;  %373 = vmatpush.msra.mxu3 %v346_v60 }
 0x10d   :  { %v208_v37 = vsel %vm206_vm7, %v203_v36, %v159_v35 }
 0x10e   :  { %v157_v28 = vpop.permute.xlu0 %156  ;;  %v213_v40 = vsel %vm211_vm8, %v208_v37, %v182_v30  ;;  %374 = vmatpush.msra.mxu3 %v345_v62  ;;  %v338_v30 = vsub.f32 1.0, %v337_v25 }
 0x10f   :  { %v207_v31 = vsel %vm206_vm7, %v202_v29, %v157_v28 }
 0x110   :  { %v212_v34 = vsel %vm211_vm8, %v207_v31, %v180_v26  ;;  %404 = vmatpush.msrb.mxu3 %v381_v9  ;;  %v339_v35 = vmul.f32 %v486_v19, %v338_v30 }
 0x111   :  { %264 = vmatmul.f32.vlgmr.msra.gmra.mxu1 %v212_v34 }
 0x114   :  { %v184_v43 = vpop.permute.xlu1 %183  ;;  %v294_v52 = vpop.f32.mrf.mxu2 }
 0x116   :  { %v161_v39 = vpop.permute.xlu0 %160 }
 0x117   :  { %v209_v44 = vsel %vm206_vm7, %v204_v14, %v161_v39  ;;  %v340_v39 = vadd.f32 %v486_v19, %v339_v35 }
 0x118   :  { %v214_v45 = vsel %vm211_vm8, %v209_v44, %v184_v43 }
 0x119   :  { %267 = vmatmul.f32.gmra.mxu1 %v213_v40  ;;  %v342_v43 = vsel %vm341_vm9, %v486_v19, %v340_v39 }
 0x11c   :  { %v186_v49 = vpop.permute.xlu1 %185  ;;  %v297_v55 = vpop.f32.mrf.mxu2 }
 0x11e   :  { %v163_v47 = vpop.permute.xlu0 %162 }
 0x11f   :  { %v210_v48 = vsel %vm206_vm7, %v205_v18, %v163_v47  ;;  %v380_v47 = vld [vmem:[%s807_s8] sm:$0xff] }
 0x120   :  { %v215_v51 = vsel %vm211_vm8, %v210_v48, %v186_v49  ;;  %405 = vmatpush.msrb.mxu3 %v380_v47  ;;  %v411_v18 = vld [vmem:[%s809_s10] sm:$0xff] }
 0x121   :  { %270 = vmatmul.f32.gmra.mxu1 %v214_v45  ;;  %v482_v48 = vld [vmem:[%s806_s7] ss:$0 sm:$0xff]  ;;  %s446_s7 = sshll.u32 %s517_s30, 4  ;;  %s447_s7 = int_to_ptr.vmem [resolvable:$true] %s446_s7 }
 0x124   :  { %v300_v4 = vpop.f32.mrf.mxu2 }
 0x129   :  { %273 = vmatmul.f32.gmra.mxu1 %v215_v51 }
 0x12c   :  { %v303_v20 = vpop.f32.mrf.mxu2 }
 0x18e   :  { %v265_v53 = vpop.f32.mrf.mxu1 }
 0x18f   :  { %v266_v54 = vadd.f32 %v480_v41, %v265_v53 }
 0x191   :  { %v295_v57 = vadd.f32 %v294_v52, %v266_v54 }
 0x193   :  { %v310_v63 = vmul.f32 %v481_v58, %v295_v57 }
 0x195   :  { %v314_v2 = vadd.f32 %v310_v63, %v614_v11 }
 0x196   :  { %v268_v59 = vpop.f32.mrf.mxu1 }
 0x197   :  { %v269_v61 = vadd.f32 %v480_v41, %v268_v59  ;;  %v318_v8 = vsel %vm201_vm3, %v314_v2, 0.0 }
 0x199   :  { %v298_v0 = vadd.f32 %v297_v55, %v269_v61 }
 0x19b   :  { %v311_v1 = vmul.f32 %v481_v58, %v298_v0 }
 0x19d   :  { %v315_v3 = vadd.f32 %v311_v1, %v620_v15 }
 0x19e   :  { %v271_v5 = vpop.f32.mrf.mxu1 }
 0x19f   :  { %v319_v6 = vsel %vm201_vm3, %v315_v3, 0.0  ;;  %v272_v7 = vadd.f32 %v480_v41, %v271_v5 }
 0x1a0   :  { %v320_v10 = vadd.f32 %v319_v6, %v318_v8 }
 0x1a1   :  { %v301_v13 = vadd.f32 %v300_v4, %v272_v7 }
 0x1a2   :  { %v321_v16 = vrot.slane %v320_v10, 4 }
 0x1a3   :  { %v312_v17 = vmul.f32 %v481_v58, %v301_v13 }
 0x1a4   :  { %v322_v22 = vadd.f32 %v321_v16, %v320_v10 }
 0x1a5   :  { %v316_v23 = vadd.f32 %v312_v17, %v637_v32 }
 0x1a6   :  { %v274_v11 = vpop.f32.mrf.mxu1  ;;  %v323_v27 = vrot.slane %v322_v22, 2 }
 0x1a7   :  { %v275_v15 = vadd.f32 %v480_v41, %v274_v11  ;;  %v327_v28 = vsel %vm201_vm3, %v316_v23, 0.0  ;;  %v483_v41 = vld [vmem:[%s808_s9] ss:$0 sm:$0xff] }
 0x1a8   :  { %v324_v34 = vadd.f32 %v323_v27, %v322_v22 }
 0x1a9   :  { %v304_v21 = vadd.f32 %v303_v20, %v275_v15 }
 0x1aa   :  { %v325_v37 = vrot.slane %v324_v34, 1 }
 0x1ab   :  { %v313_v24 = vmul.f32 %v481_v58, %v304_v21 }
 0x1ac   :  { %v326_v32 = vadd.f32 %v325_v37, %v324_v34 }
 0x1ad   :  { %v317_v26 = vadd.f32 %v313_v24, %v650_v42 }
 0x1ae   :  { %v343_v44 = vmul.f32 %v342_v43, %v326_v32 }
 0x1af   :  { %v328_v29 = vsel %vm201_vm3, %v317_v26, 0.0 }
 0x1b0   :  { %v329_v31 = vadd.f32 %v328_v29, %v327_v28 }
 0x1b2   :  { %v330_v33 = vrot.slane %v329_v31, 4 }
 0x1b4   :  { %v331_v36 = vadd.f32 %v330_v33, %v329_v31 }
 0x1b6   :  { %v332_v38 = vrot.slane %v331_v36, 2 }
 0x1b8   :  { %v333_v40 = vadd.f32 %v332_v38, %v331_v36 }
 0x1ba   :  { %v334_v14 = vrot.slane %v333_v40, 1 }
 0x1bc   :  { %v335_v42 = vadd.f32 %v334_v14, %v333_v40 }
 0x1be   :  { %v344_v45 = vmul.f32 %v342_v43, %v335_v42 }
 0x1c0   :  { %v356_v46 = vsel %vm355_vm10, %v344_v45, %v343_v44 }
 0x1c1   :  { %466 = vmatmul.msk.f32.vlgmr.msra.gmra.mxu3 %vm201_vm3, %v356_v46 }
 0x1c2   :  { %435 = vmatpush.msra.mxu3 %v411_v18 }
 0x244   :  { %v376_v49 = vpop.f32.mrf.mxu3 }
 0x245   :  { %v377_v51 = vadd.f32 %v482_v48, %v376_v49 }
 0x247   :  { %v379_v52 = vmax.f32 %v377_v51, 0.0 }
 0x249   :  { %467 = vmatmul.msk.f32.vlgmr.msrb.gmra.mxu3 %vm386_vm11, %v379_v52 }
 0x2cc   :  { %v407_v53 = vpop.f32.mrf.mxu3 }
 0x2cd   :  { %v408_v54 = vadd.f32 %v483_v41, %v407_v53 }
 0x2cf   :  { %v410_v55 = vmax.f32 %v408_v54, 0.0 }
 0x2d1   :  { %468 = vmatmul.msk.f32.vlgmr.msra.gmra.mxu3 %vm416_vm12, %v410_v55 }
 0x354   :  { %v437_v50 = vpop.f32.mrf.mxu3 }
 0x355   :  { %v438_v57 = vadd.f32 %v484_v56, %v437_v50 }
 0x357   :  { %440 = vst [vmem:[#allocation2] sm:$0x3] %v438_v57 }
 0x358   :  { %451 = dma.vmem_to_hbm [thread:$0]  %s447_s7, 32, %s449_s3, [#allocation3]  }
 0x359   :  { %511 = dma.done.wait [#allocation3], 32  }
 0x35a   :  { %512 = vsyncadd [#allocation3], 4294967264 }
 0x35b   :  { %456 = vsyncpa [#allocation3], 1 }

</bundles_post_ra>
